<compile_context>
chip_gen: v5e
topology: v5e:2x2
jax: 0.10.0
libtpu: 0.0.40
codegen_flags: <defaults>
</compile_context>

<pallas_src>
import functools

import jax
import jax.numpy as jnp
from jax.experimental import pallas as pl
from jax.experimental.pallas import tpu as pltpu


def _round_up(v, m):
    return (v + m - 1) // m * m


def _prenorm_residual_kernel(x_ref, g_ref, b_ref, w1_ref, b1_ref, w2_ref,
                             b2_ref, o_ref, *, eps, d_actual):
    # x tile: (TR, Dp), f32.  Padded feature columns are zero.
    x = x_ref[...].astype(jnp.float32)

    # ---- LayerNorm over the true feature count, single-pass stats ----
    inv_d = jnp.float32(1.0 / d_actual)
    s1 = jnp.sum(x, axis=-1, keepdims=True)
    s2 = jnp.sum(x * x, axis=-1, keepdims=True)
    mu = s1 * inv_d
    var = s2 * inv_d - mu * mu
    inv = jax.lax.rsqrt(var + eps)
    # gamma/beta are zero-padded, so padded columns normalize to exactly 0.
    xn = (x - mu) * inv * g_ref[...] + b_ref[...]            # (TR, Dp) f32

    # ---- fn: Linear -> GELU -> Linear.  bf16 MXU operands, f32 accum ----
    # TODO(synk): PyTorch nn.GELU() default is the exact erf form; tanh-approx
    # GELU is used here for a guaranteed TPU (EUP tanh) lowering.
    h = jnp.dot(xn.astype(jnp.bfloat16), w1_ref[...],
                preferred_element_type=jnp.float32) + b1_ref[...]
    h = jax.nn.gelu(h, approximate=True)                      # f32 elementwise
    y = jnp.dot(h.astype(jnp.bfloat16), w2_ref[...],
                preferred_element_type=jnp.float32) + b2_ref[...]

    # ---- residual ----
    o_ref[...] = (y + x).astype(o_ref.dtype)


def prenorm_residual(x, gamma, beta, w1, b1, w2, b2, *, eps=1e-5,
                     row_tile=512):
    """x: (B, N, dim). Returns fn(LayerNorm(x)) + x with the same shape/dtype."""
    B, N, D = x.shape
    H = w1.shape[1]
    rows = B * N

    # Lane-dense padding of the feature / hidden dims.
    Dp = _round_up(D, 128)
    Hp = _round_up(H, 128)

    # Row tile: as large as requested, multiple of 16 (bf16-safe sublanes),
    # never larger than the (padded) row count.
    tr = _round_up(min(row_tile, _round_up(rows, 16)), 16)
    rows_p = _round_up(rows, tr)
    grid = (rows_p // tr,)

    f32 = jnp.float32
    x2 = jnp.pad(x.reshape(rows, D).astype(f32),
                 ((0, rows_p - rows), (0, Dp - D)))
    g2 = jnp.pad(gamma.astype(f32), (0, Dp - D)).reshape(1, Dp)
    be2 = jnp.pad(beta.astype(f32), (0, Dp - D)).reshape(1, Dp)
    w1p = jnp.pad(w1.astype(f32), ((0, Dp - D), (0, Hp - H))).astype(jnp.bfloat16)
    b1p = jnp.pad(b1.astype(f32), (0, Hp - H)).reshape(1, Hp)
    w2p = jnp.pad(w2.astype(f32), ((0, Hp - H), (0, Dp - D))).astype(jnp.bfloat16)
    b2p = jnp.pad(b2.astype(f32), (0, Dp - D)).reshape(1, Dp)

    kernel = functools.partial(_prenorm_residual_kernel, eps=eps, d_actual=D)

    # Grid-invariant params live whole in VMEM (single copy, no pipelining).
    resident = pl.BlockSpec(memory_space=pltpu.MemorySpace.VMEM)

    # Scoped-VMEM budget: double-buffered activation tiles + resident params
    # + elementwise intermediates, with headroom.  Clamp to stay within the
    # smallest physical VMEM (v7x: 64 MiB).
    weight_bytes = w1p.size * 2 + w2p.size * 2                 # bf16
    param_bytes = (g2.size + be2.size + b1p.size + b2p.size) * 4
    act_bytes = 2 * 2 * tr * Dp * 4                            # x in + out, 2-buffered
    scratch_bytes = 4 * tr * max(Dp, Hp) * 4                   # h / temporaries
    vmem_limit = int(min(max(2 * (weight_bytes + param_bytes + act_bytes
                                  + scratch_bytes),
                             32 * 1024 * 1024),
                         48 * 1024 * 1024))

    cost = pl.CostEstimate(
        flops=2 * 2 * rows_p * Dp * Hp,                        # two matmuls
        transcendentals=rows_p * Hp,                           # GELU tanh
        bytes_accessed=2 * rows_p * Dp * 4 + weight_bytes + param_bytes,
    )

    out = pl.pallas_call(
        kernel,
        out_shape=jax.ShapeDtypeStruct((rows_p, Dp), x.dtype),
        grid_spec=pltpu.PrefetchScalarGridSpec(
            num_scalar_prefetch=0,
            grid=grid,
            in_specs=[
                pl.BlockSpec((tr, Dp), lambda i: (i, 0)),      # x row tile
                resident,                                      # gamma
                resident,                                      # beta
                resident,                                      # W1 (bf16)
                resident,                                      # b1
                resident,                                      # W2 (bf16)
                resident,                                      # b2
            ],
            out_specs=pl.BlockSpec((tr, Dp), lambda i: (i, 0)),
        ),
        compiler_params=pltpu.CompilerParams(
            dimension_semantics=("parallel",),
            vmem_limit_bytes=vmem_limit),
        cost_estimate=cost,
    )(x2, g2, be2, w1p, b1p, w2p, b2p)

    return out[:rows, :D].reshape(B, N, D)


def _reference(x, gamma, beta, w1, b1, w2, b2, eps=1e-5):
    xf = x.astype(jnp.float32)
    mu = jnp.mean(xf, axis=-1, keepdims=True)
    var = jnp.mean((xf - mu) ** 2, axis=-1, keepdims=True)
    xn = (xf - mu) * jax.lax.rsqrt(var + eps) * gamma + beta
    h = jnp.dot(xn.astype(jnp.bfloat16), w1.astype(jnp.bfloat16),
                preferred_element_type=jnp.float32) + b1
    h = jax.nn.gelu(h, approximate=True)
    y = jnp.dot(h.astype(jnp.bfloat16), w2.astype(jnp.bfloat16),
                preferred_element_type=jnp.float32) + b2
    return y + xf


if __name__ == "__main__":
    key = jax.random.PRNGKey(0)
    B, N, D, H = 2, 8, 32, 64  # batch=2, seq=8, dim=32, hidden=64

    kx, kg, kb, kw1, kb1, kw2, kb2 = jax.random.split(key, 7)
    x = jax.random.normal(kx, (B, N, D), dtype=jnp.float32)

    gamma = 1.0 + 0.1 * jax.random.normal(kg, (D,), jnp.float32)
    beta = 0.05 * jax.random.normal(kb, (D,), jnp.float32)
    w1 = jax.random.normal(kw1, (D, H), jnp.float32) * 0.05
    b1 = jax.random.normal(kb1, (H,), jnp.float32) * 0.01
    w2 = jax.random.normal(kw2, (H, D), jnp.float32) * 0.05
    b2 = jax.random.normal(kb2, (D,), jnp.float32) * 0.01

    out = jax.block_until_ready(
        prenorm_residual(x, gamma, beta, w1, b1, w2, b2))
    ref = _reference(x, gamma, beta, w1, b1, w2, b2)

    assert out.shape == x.shape and out.dtype == x.dtype
    err = float(jnp.max(jnp.abs(out - ref)))
    assert jnp.allclose(out, ref, atol=2e-2, rtol=2e-2), f"mismatch: {err}"

    print("KERNEL_OK")
</pallas_src>

<mosaic_0001>
module attributes {stable_mosaic.version = 11 : i64} {
  func.func @_prenorm_residual_kernel(%arg0: i32, %arg1: memref<16x128xf32, #tpu.memory_space<vmem>>, %arg2: memref<1x128xf32, #tpu.memory_space<vmem>>, %arg3: memref<1x128xf32, #tpu.memory_space<vmem>>, %arg4: memref<128x128xbf16, #tpu.memory_space<vmem>>, %arg5: memref<1x128xf32, #tpu.memory_space<vmem>>, %arg6: memref<128x128xbf16, #tpu.memory_space<vmem>>, %arg7: memref<1x128xf32, #tpu.memory_space<vmem>>, %arg8: memref<16x128xf32, #tpu.memory_space<vmem>>) attributes {dimension_semantics = [#tpu.dimension_semantics<parallel>], iteration_bounds = array<i64: 1>, scalar_prefetch = 0 : i64, scratch_operands = 0 : i64, tpu.core_type = #tpu.core_type<tc>, window_params = [{transform_indices = @transform_0, window_bounds = array<i64: 16, 128>}, {pipeline_mode = #tpu.pipeline_mode<synchronous>, transform_indices = @transform_1, window_bounds = array<i64: 1, 128>}, {pipeline_mode = #tpu.pipeline_mode<synchronous>, transform_indices = @transform_2, window_bounds = array<i64: 1, 128>}, {pipeline_mode = #tpu.pipeline_mode<synchronous>, transform_indices = @transform_3, window_bounds = array<i64: 128, 128>}, {pipeline_mode = #tpu.pipeline_mode<synchronous>, transform_indices = @transform_4, window_bounds = array<i64: 1, 128>}, {pipeline_mode = #tpu.pipeline_mode<synchronous>, transform_indices = @transform_5, window_bounds = array<i64: 128, 128>}, {pipeline_mode = #tpu.pipeline_mode<synchronous>, transform_indices = @transform_6, window_bounds = array<i64: 1, 128>}, {transform_indices = @transform_7, window_bounds = array<i64: 16, 128>}]} {
    %c0 = arith.constant 0 : index
    %c0_0 = arith.constant 0 : index
    %0 = vector.load %arg1[%c0, %c0_0] : memref<16x128xf32, #tpu.memory_space<vmem>>, vector<16x128xf32>
    %cst = arith.constant dense<0.000000e+00> : vector<16xf32>
    %1 = vector.multi_reduction <add>, %0, %cst [1] : vector<16x128xf32> to vector<16xf32>
    %2 = vector.shape_cast %1 : vector<16xf32> to vector<16x1xf32>
    %3 = arith.mulf %0, %0 : vector<16x128xf32>
    %cst_1 = arith.constant dense<0.000000e+00> : vector<16xf32>
    %4 = vector.multi_reduction <add>, %3, %cst_1 [1] : vector<16x128xf32> to vector<16xf32>
    %5 = vector.shape_cast %4 : vector<16xf32> to vector<16x1xf32>
    %cst_2 = arith.constant 3.125000e-02 : f32
    %6 = vector.broadcast %cst_2 : f32 to vector<16x1xf32>
    %7 = arith.mulf %2, %6 : vector<16x1xf32>
    %cst_3 = arith.constant 3.125000e-02 : f32
    %8 = vector.broadcast %cst_3 : f32 to vector<16x1xf32>
    %9 = arith.mulf %5, %8 : vector<16x1xf32>
    %10 = arith.mulf %7, %7 : vector<16x1xf32>
    %11 = arith.subf %9, %10 : vector<16x1xf32>
    %cst_4 = arith.constant 9.99999974E-6 : f32
    %12 = vector.broadcast %cst_4 : f32 to vector<16x1xf32>
    %13 = arith.addf %11, %12 : vector<16x1xf32>
    %14 = math.rsqrt %13 : vector<16x1xf32>
    %15 = vector.broadcast %7 : vector<16x1xf32> to vector<16x128xf32>
    %16 = arith.subf %0, %15 : vector<16x128xf32>
    %17 = vector.broadcast %14 : vector<16x1xf32> to vector<16x128xf32>
    %18 = arith.mulf %16, %17 : vector<16x128xf32>
    %c0_5 = arith.constant 0 : index
    %c0_6 = arith.constant 0 : index
    %19 = vector.load %arg2[%c0_5, %c0_6] : memref<1x128xf32, #tpu.memory_space<vmem>>, vector<1x128xf32>
    %20 = vector.broadcast %19 : vector<1x128xf32> to vector<16x128xf32>
    %21 = arith.mulf %18, %20 : vector<16x128xf32>
    %c0_7 = arith.constant 0 : index
    %c0_8 = arith.constant 0 : index
    %22 = vector.load %arg3[%c0_7, %c0_8] : memref<1x128xf32, #tpu.memory_space<vmem>>, vector<1x128xf32>
    %23 = vector.broadcast %22 : vector<1x128xf32> to vector<16x128xf32>
    %24 = arith.addf %21, %23 : vector<16x128xf32>
    %25 = arith.truncf %24 : vector<16x128xf32> to vector<16x128xbf16>
    %c0_9 = arith.constant 0 : index
    %c0_10 = arith.constant 0 : index
    %26 = vector.load %arg4[%c0_9, %c0_10] : memref<128x128xbf16, #tpu.memory_space<vmem>>, vector<128x128xbf16>
    %cst_11 = arith.constant dense<0.000000e+00> : vector<16x128xf32>
    %27 = tpu.matmul %25, %26, %cst_11 {dimension_numbers = #tpu.dot_dimension_numbers<[1], [0], [0], [1], [0, 0, 1, 1], [], []>} : vector<16x128xbf16>, vector<128x128xbf16>, vector<16x128xf32> -> vector<16x128xf32>
    %c0_12 = arith.constant 0 : index
    %c0_13 = arith.constant 0 : index
    %28 = vector.load %arg5[%c0_12, %c0_13] : memref<1x128xf32, #tpu.memory_space<vmem>>, vector<1x128xf32>
    %29 = vector.broadcast %28 : vector<1x128xf32> to vector<16x128xf32>
    %30 = arith.addf %27, %29 : vector<16x128xf32>
    %31 = arith.mulf %30, %30 : vector<16x128xf32>
    %32 = arith.mulf %30, %31 : vector<16x128xf32>
    %cst_14 = arith.constant 4.471500e-02 : f32
    %33 = vector.broadcast %cst_14 : f32 to vector<16x128xf32>
    %34 = arith.mulf %33, %32 : vector<16x128xf32>
    %35 = arith.addf %30, %34 : vector<16x128xf32>
    %cst_15 = arith.constant 0.797884583 : f32
    %36 = vector.broadcast %cst_15 : f32 to vector<16x128xf32>
    %37 = arith.mulf %36, %35 : vector<16x128xf32>
    %38 = math.tanh %37 : vector<16x128xf32>
    %cst_16 = arith.constant 1.000000e+00 : f32
    %39 = vector.broadcast %cst_16 : f32 to vector<16x128xf32>
    %40 = arith.addf %39, %38 : vector<16x128xf32>
    %cst_17 = arith.constant 5.000000e-01 : f32
    %41 = vector.broadcast %cst_17 : f32 to vector<16x128xf32>
    %42 = arith.mulf %41, %40 : vector<16x128xf32>
    %43 = arith.mulf %30, %42 : vector<16x128xf32>
    %44 = arith.truncf %43 : vector<16x128xf32> to vector<16x128xbf16>
    %c0_18 = arith.constant 0 : index
    %c0_19 = arith.constant 0 : index
    %45 = vector.load %arg6[%c0_18, %c0_19] : memref<128x128xbf16, #tpu.memory_space<vmem>>, vector<128x128xbf16>
    %cst_20 = arith.constant dense<0.000000e+00> : vector<16x128xf32>
    %46 = tpu.matmul %44, %45, %cst_20 {dimension_numbers = #tpu.dot_dimension_numbers<[1], [0], [0], [1], [0, 0, 1, 1], [], []>} : vector<16x128xbf16>, vector<128x128xbf16>, vector<16x128xf32> -> vector<16x128xf32>
    %c0_21 = arith.constant 0 : index
    %c0_22 = arith.constant 0 : index
    %47 = vector.load %arg7[%c0_21, %c0_22] : memref<1x128xf32, #tpu.memory_space<vmem>>, vector<1x128xf32>
    %48 = vector.broadcast %47 : vector<1x128xf32> to vector<16x128xf32>
    %49 = arith.addf %46, %48 : vector<16x128xf32>
    %50 = arith.addf %49, %0 : vector<16x128xf32>
    %c0_23 = arith.constant 0 : index
    %c0_24 = arith.constant 0 : index
    %51 = vector.load %arg8[%c0_23, %c0_24] : memref<16x128xf32, #tpu.memory_space<vmem>>, vector<16x128xf32>
    tpu.vector_store %arg8[%c0_23, %c0_24], %50 {strides = array<i32>} : memref<16x128xf32, #tpu.memory_space<vmem>>, vector<16x128xf32>,
    return
  }
  func.func @transform_0(%arg0: i32) -> (i32, i32) {
    %c0_i32 = arith.constant 0 : i32
    %c0_i32_0 = arith.constant 0 : i32
    return %arg0, %c0_i32 : i32, i32
  }
  func.func @transform_1(%arg0: i32) -> (i32, i32) {
    %c0_i32 = arith.constant 0 : i32
    %c0_i32_0 = arith.constant 0 : i32
    %c0_i32_1 = arith.constant 0 : i32
    return %c0_i32, %c0_i32_0 : i32, i32
  }
  func.func @transform_2(%arg0: i32) -> (i32, i32) {
    %c0_i32 = arith.constant 0 : i32
    %c0_i32_0 = arith.constant 0 : i32
    %c0_i32_1 = arith.constant 0 : i32
    return %c0_i32, %c0_i32_0 : i32, i32
  }
  func.func @transform_3(%arg0: i32) -> (i32, i32) {
    %c0_i32 = arith.constant 0 : i32
    %c0_i32_0 = arith.constant 0 : i32
    %c0_i32_1 = arith.constant 0 : i32
    return %c0_i32, %c0_i32_0 : i32, i32
  }
  func.func @transform_4(%arg0: i32) -> (i32, i32) {
    %c0_i32 = arith.constant 0 : i32
    %c0_i32_0 = arith.constant 0 : i32
    %c0_i32_1 = arith.constant 0 : i32
    return %c0_i32, %c0_i32_0 : i32, i32
  }
  func.func @transform_5(%arg0: i32) -> (i32, i32) {
    %c0_i32 = arith.constant 0 : i32
    %c0_i32_0 = arith.constant 0 : i32
    %c0_i32_1 = arith.constant 0 : i32
    return %c0_i32, %c0_i32_0 : i32, i32
  }
  func.func @transform_6(%arg0: i32) -> (i32, i32) {
    %c0_i32 = arith.constant 0 : i32
    %c0_i32_0 = arith.constant 0 : i32
    %c0_i32_1 = arith.constant 0 : i32
    return %c0_i32, %c0_i32_0 : i32, i32
  }
  func.func @transform_7(%arg0: i32) -> (i32, i32) {
    %c0_i32 = arith.constant 0 : i32
    %c0_i32_0 = arith.constant 0 : i32
    return %arg0, %c0_i32 : i32, i32
  }
}

</mosaic_0001>

<bundles_post_ra>
// kernel: tpu_custom_call.1
= control target key start
LH: loop header
LB: loop body
LE: loop exit
PB: predicated region body
PF: predicated region fallthrough
CT: control target
= control target key end

     0   :  { %12 = vsyncpa [#allocation3], 0  ;;  %s677_s0 = inlined_call_operand.hbm [shape: f32[16,128], index: 0, kind: input, shape index: {}]   ;;  %s678_s1 = inlined_call_operand.hbm [shape: f32[1,128], index: 1, kind: input, shape index: {}]   ;;  %s679_s2 = inlined_call_operand.vmem [shape: f32[1,128], index: 2, kind: input, shape index: {}]   ;;  %s680_s3 = inlined_call_operand.hbm [shape: bf16[128,128], index: 3, kind: input, shape index: {}]   ;;  %s681_s4 = inlined_call_operand.vmem [shape: f32[1,128], index: 4, kind: input, shape index: {}]   ;;  %s682_s5 = inlined_call_operand.hbm [shape: bf16[128,128], index: 5, kind: input, shape index: {}]   ;;  %s683_s6 = inlined_call_operand.vmem [shape: f32[1,128], index: 6, kind: input, shape index: {}]   ;;  %s684_s7 = inlined_call_operand.hbm [shape: f32[16,128], index: 7, kind: output, shape index: {}]  }
   0x1   :  { %13 = vsyncpa [#allocation6], 0 }
   0x2   :  { %14 = vsyncpa [#allocation9], 0  ;;  %s34_s26 = sshll.u32 %s678_s1, 4  ;;  %s35_s26 = int_to_ptr.hbm [resolvable:$true] %s34_s26 }
   0x3   :  { %15 = vsyncpa [#allocation4], 0  ;;  %s584_s27 = smov [#allocation5]   ;;  %s20_s8 = sshll.u32 %s677_s0, 4  ;;  %s21_s8 = int_to_ptr.hbm [resolvable:$true] %s20_s8 }
   0x4   :  { %s36_s28 = sshll.u32 %s584_s27, 4  ;;  %s585_s9 = smov [#allocation2]   ;;  %s37_s28 = int_to_ptr.vmem [resolvable:$true] %s36_s28 }
   0x5   :  { %39 = dma.hbm_to_vmem [thread:$0]  %s35_s26, 16, %s37_s28, [#allocation6]  }
   0x6   :  { %s22_s10 = sshll.u32 %s585_s9, 4  ;;  %s586_s11 = smov 128   ;;  %s23_s10 = int_to_ptr.vmem [resolvable:$true] %s22_s10 }
   0x7   :  { %s587_s12 = smov 8   ;;  %s46_s14 = sshll.u32 %s680_s3, 4  ;;  %s47_s14 = int_to_ptr.hbm [resolvable:$true] %s46_s14 }
   0x8   :  { %28 = dma.hbm_to_vmem [thread:$0]  %s21_s8, 256, %s23_s10, [#allocation3], %s586_s11, %s586_s11, %s587_s12  }
   0x9   :  { %s588_s15 = smov [#allocation7]   ;;  %s61_s18 = sshll.u32 %s682_s5, 4  ;;  %s62_s18 = int_to_ptr.hbm [resolvable:$true] %s61_s18 }
   0xa   :  { %s48_s16 = sshll.u32 %s588_s15, 4  ;;  %s589_s19 = smov 64   ;;  %s49_s16 = int_to_ptr.vmem [resolvable:$true] %s48_s16 }
   0xb   :  { %s590_s20 = smov 4   ;;  %s591_s21 = smov [#allocation8]  }
   0xc   :  { %54 = dma.hbm_to_vmem [thread:$0]  %s47_s14, 1024, %s49_s16, [#allocation6], %s589_s19, %s589_s19, %s590_s20  }
   0xd   :  { %s63_s22 = sshll.u32 %s591_s21, 4  ;;  %s64_s22 = int_to_ptr.vmem [resolvable:$true] %s63_s22 }
   0xe   :  { %69 = dma.hbm_to_vmem [thread:$0]  %s62_s18, 1024, %s64_s22, [#allocation9], %s589_s19, %s589_s19, %s590_s20  }
   0xf   :  { %576 = dma.done.wait [#allocation3], 256  }
  0x10   :  { %577 = vsyncadd [#allocation3], 4294967040 }
  0x11   :  { %578 = dma.done.wait [#allocation6], 1040  }
  0x12   :  { %579 = vsyncadd [#allocation6], 4294966256 }
  0x13   :  { %580 = dma.done.wait [#allocation9], 1024  }
  0x14   :  { %581 = vsyncadd [#allocation9], 4294966272  ;;  %v648_v0 = vld [vmem:[#allocation2] sm:$0xff]  ;;  %v653_v2 = vld [vmem:[#allocation2 + $0x8] sm:$0xff]  ;;  %s592_s25 = smov [#allocation10]   ;;  %s340_s29 = sshll.u32 %s684_s7, 4  ;;  %s341_s29 = int_to_ptr.hbm [resolvable:$true] %s340_s29 }
  0x15   :  { %90 = vadd.xlane.f32.xlu0 %v648_v0  ;;  %v94_v1 = vmul.f32 %v648_v0, %v648_v0  ;;  %v95_v3 = vmul.f32 %v653_v2, %v653_v2  ;;  %v426_v4 = vld [vmem:[#allocation7 + $0x38] sm:$0xff]  ;;  %v425_v5 = vld [vmem:[#allocation7 + $0x30] sm:$0xff]  ;;  %v424_v6 = vld [vmem:[#allocation7 + $0x28] sm:$0xff]  ;;  %s338_s26 = sshll.u32 %s592_s25, 4  ;;  %s339_s26 = int_to_ptr.vmem [resolvable:$true] %s338_s26 }
  0x16   :  { %215 = vmatpush.bf16.msra.mxu0 %v426_v4  ;;  %v423_v7 = vld [vmem:[#allocation7 + $0x20] sm:$0xff]  ;;  %v422_v8 = vld [vmem:[#allocation7 + $0x18] sm:$0xff]  ;;  %v421_v9 = vld [vmem:[#allocation7 + $0x10] sm:$0xff] }
  0x17   :  { %96 = vadd.xlane.f32.xlu1 %v94_v1  ;;  %v420_v11 = vld [vmem:[#allocation7 + $0x8] sm:$0xff]  ;;  %v419_v16 = vld [vmem:[#allocation7] sm:$0xff]  ;;  %v444_v40 = vld [vmem:[#allocation5] ss:$0 sm:$0xff] }
  0x18   :  { %v445_v46 = vld [vmem:[%s679_s2] ss:$0 sm:$0xff]  ;;  %v434_v51 = vld [vmem:[#allocation8 + $0x38] sm:$0xff]  ;;  %v433_v52 = vld [vmem:[#allocation8 + $0x30] sm:$0xff] }
  0x19   :  { %316 = vmatpush.bf16.msra.mxu1 %v434_v51  ;;  %v432_v53 = vld [vmem:[#allocation8 + $0x28] sm:$0xff]  ;;  %v431_v54 = vld [vmem:[#allocation8 + $0x20] sm:$0xff]  ;;  %v430_v55 = vld [vmem:[#allocation8 + $0x18] sm:$0xff] }
  0x1a   :  { %216 = vmatpush.bf16.msra.mxu0 %v425_v5  ;;  %v429_v56 = vld [vmem:[#allocation8 + $0x10] sm:$0xff]  ;;  %v428_v57 = vld [vmem:[#allocation8 + $0x8] sm:$0xff]  ;;  %v427_v59 = vld [vmem:[#allocation8] sm:$0xff] }
  0x1b   :  { %v446_v58 = vld [vmem:[%s681_s4] ss:$0 sm:$0xff] }
  0x1d   :  { %92 = vadd.xlane.f32.xlu0 %v653_v2  ;;  %317 = vmatpush.bf16.msra.mxu1 %v433_v52 }
  0x1e   :  { %217 = vmatpush.bf16.msra.mxu0 %v424_v6 }
  0x1f   :  { %98 = vadd.xlane.f32.xlu1 %v95_v3 }
  0x21   :  { %318 = vmatpush.bf16.msra.mxu1 %v432_v53 }
  0x22   :  { %218 = vmatpush.bf16.msra.mxu0 %v423_v7 }
  0x25   :  { %319 = vmatpush.bf16.msra.mxu1 %v431_v54 }
  0x26   :  { %219 = vmatpush.bf16.msra.mxu0 %v422_v8 }
  0x29   :  { %320 = vmatpush.bf16.msra.mxu1 %v430_v55 }
  0x2a   :  { %220 = vmatpush.bf16.msra.mxu0 %v421_v9 }
  0x2d   :  { %321 = vmatpush.bf16.msra.mxu1 %v429_v56 }
  0x2e   :  { %221 = vmatpush.bf16.msra.mxu0 %v420_v11 }
  0x31   :  { %322 = vmatpush.bf16.msra.mxu1 %v428_v57 }
  0x32   :  { %222 = vmatpush.bf16.msra.mxu0 %v419_v16 }
  0x35   :  { %323 = vmatpush.bf16.msra.mxu1 %v427_v59 }
  0x88   :  { %v91_v10 = vpop.xlane.xlu0 %90 }
  0x89   :  { %v100_v12 = vmul.f32 0.03125, %v91_v10 }
  0x8a   :  { %v97_v13 = vpop.xlane.xlu1 %96 }
  0x8b   :  { %v104_v14 = vmul.f32 %v100_v12, %v100_v12  ;;  %v102_v15 = vmul.f32 0.03125, %v97_v13  ;;  %v130_v37 = vsub.f32 %v648_v0, %v100_v12 }
  0x8d   :  { %v106_v17 = vsub.f32 %v102_v15, %v104_v14 }
  0x8f   :  { %v108_v18 = vadd.f32 1e-05, %v106_v17 }
  0x90   :  { %v93_v19 = vpop.xlane.xlu0 %92 }
  0x91   :  { %448 = vrsqrt.f32 %v108_v18  ;;  %v101_v20 = vmul.f32 0.03125, %v93_v19  ;;  %vm116_vm1 = vweird.f32 %v108_v18 }
  0x92   :  { %v99_v21 = vpop.xlane.xlu1 %98 }
  0x93   :  { %v105_v22 = vmul.f32 %v101_v20, %v101_v20  ;;  %v103_v23 = vmul.f32 0.03125, %v99_v21  ;;  %v131_v42 = vsub.f32 %v653_v2, %v101_v20  ;;  %v447_v21 = vld [vmem:[%s683_s6] ss:$0 sm:$0xff] }
  0x95   :  { %v107_v24 = vsub.f32 %v103_v23, %v105_v22 }
  0x97   :  { %v449_v25 = vpop.eup %448  ;;  %v109_v26 = vadd.f32 1e-05, %v107_v24 }
  0x98   :  { %v111_v27 = vmul.f32 %v449_v25, %v108_v18  ;;  %vm117_vm0 = vweird.f32 %v449_v25 }
  0x99   :  { %450 = vrsqrt.f32 %v109_v26  ;;  %vm118_vm2 = vmor %vm116_vm1, %vm117_vm0  ;;  %vm126_vm4 = vweird.f32 %v109_v26 }
  0x9a   :  { %v112_v28 = vmul.f32 %v449_v25, %v111_v27 }
  0x9c   :  { %v113_v29 = vmul.f32 0.5, %v112_v28 }
  0x9e   :  { %v114_v30 = vsub.f32 1.5, %v113_v29 }
  0x9f   :  { %v451_v31 = vpop.eup %450 }
  0xa0   :  { %v115_v32 = vmul.f32 %v449_v25, %v114_v30  ;;  %v121_v33 = vmul.f32 %v451_v31, %v109_v26  ;;  %vm127_vm3 = vweird.f32 %v451_v31 }
  0xa1   :  { %vm128_vm5 = vmor %vm126_vm4, %vm127_vm3 }
  0xa2   :  { %v122_v34 = vmul.f32 %v451_v31, %v121_v33  ;;  %v119_v36 = vsel %vm118_vm2, %v449_v25, %v115_v32 }
  0xa3   :  { %v132_v39 = vmul.f32 %v130_v37, %v119_v36 }
  0xa4   :  { %v123_v35 = vmul.f32 0.5, %v122_v34 }
  0xa5   :  { %v138_v45 = vmul.f32 %v444_v40, %v132_v39 }
  0xa6   :  { %v124_v38 = vsub.f32 1.5, %v123_v35 }
  0xa7   :  { %v144_v48 = vadd.f32 %v445_v46, %v138_v45 }
  0xa8   :  { %v125_v41 = vmul.f32 %v451_v31, %v124_v38 }
  0xaa   :  { %v129_v43 = vsel %vm128_vm5, %v451_v31, %v125_v41 }
  0xab   :  { %v133_v44 = vmul.f32 %v131_v42, %v129_v43 }
  0xad   :  { %v139_v47 = vmul.f32 %v444_v40, %v133_v44 }
  0xaf   :  { %v145_v49 = vadd.f32 %v445_v46, %v139_v47 }
  0xb1   :  { %v146_v50 = vpack.c.bf16 %v145_v49, %v144_v48 }
  0xb3   :  { %223 = vmatmul.bf16.vlgmr.msra.gmra.mxu0 %v146_v50 }
 0x130   :  { %v224_v60 = vpop.f32.mrf.mxu0 }
 0x131   :  { %v225_v61 = vadd.f32 %v446_v58, %v224_v60 }
 0x133   :  { %v229_v62 = vmul.f32 %v225_v61, %v225_v61 }
 0x135   :  { %v231_v63 = vmul.f32 %v229_v62, %v225_v61 }
 0x137   :  { %v233_v1 = vmul.f32 0.044715, %v231_v63 }
 0x138   :  { %v226_v3 = vpop.f32.mrf.mxu0 }
 0x139   :  { %v235_v4 = vadd.f32 %v233_v1, %v225_v61  ;;  %v227_v5 = vadd.f32 %v446_v58, %v226_v3 }
 0x13b   :  { %v230_v6 = vmul.f32 %v227_v5, %v227_v5  ;;  %v237_v7 = vmul.f32 0.7978846, %v235_v4 }
 0x13d   :  { %v232_v8 = vmul.f32 %v230_v6, %v227_v5  ;;  %452 = vtanh.f32 %v237_v7 }
 0x13f   :  { %v234_v9 = vmul.f32 0.044715, %v232_v8 }
 0x141   :  { %v236_v10 = vadd.f32 %v234_v9, %v227_v5 }
 0x143   :  { %v238_v11 = vmul.f32 0.7978846, %v236_v10  ;;  %v453_v12 = vpop.eup %452 }
 0x144   :  { %v241_v13 = vadd.f32 1.0, %v453_v12 }
 0x145   :  { %454 = vtanh.f32 %v238_v11 }
 0x146   :  { %v243_v16 = vmul.f32 0.5, %v241_v13 }
 0x148   :  { %v245_v18 = vmul.f32 %v243_v16, %v225_v61 }
 0x14b   :  { %v455_v14 = vpop.eup %454 }
 0x14c   :  { %v242_v15 = vadd.f32 1.0, %v455_v14 }
 0x14e   :  { %v244_v17 = vmul.f32 0.5, %v242_v15 }
 0x150   :  { %v246_v19 = vmul.f32 %v244_v17, %v227_v5 }
 0x152   :  { %v247_v20 = vpack.c.bf16 %v246_v19, %v245_v18 }
 0x154   :  { %324 = vmatmul.bf16.vlgmr.msra.gmra.mxu1 %v247_v20 }
 0x1d1   :  { %v325_v22 = vpop.f32.mrf.mxu1 }
 0x1d2   :  { %v326_v23 = vadd.f32 %v447_v21, %v325_v22 }
 0x1d4   :  { %v330_v24 = vadd.f32 %v326_v23, %v648_v0 }
 0x1d6   :  { %332 = vst [vmem:[#allocation10] sm:$0xff] %v330_v24 }
 0x1d9   :  { %v327_v25 = vpop.f32.mrf.mxu1 }
 0x1da   :  { %v328_v26 = vadd.f32 %v447_v21, %v327_v25 }
 0x1dc   :  { %v331_v27 = vadd.f32 %v328_v26, %v653_v2 }
 0x1de   :  { %333 = vst [vmem:[#allocation10 + $0x8] sm:$0xff] %v331_v27 }
 0x1df   :  { %346 = dma.vmem_to_hbm [thread:$0]  %s339_s26, 256, %s341_s29, [#allocation4], %s586_s11, %s586_s11, %s587_s12  }
 0x1e0   :  { %582 = dma.done.wait [#allocation4], 256  }
 0x1e1   :  { %583 = vsyncadd [#allocation4], 4294967040 }
 0x1e2   :  { %351 = vsyncpa [#allocation3], 1 }
 0x1e3   :  { %352 = vsyncpa [#allocation6], 1 }
 0x1e4   :  { %353 = vsyncpa [#allocation9], 1 }
 0x1e5   :  { %354 = vsyncpa [#allocation4], 1 }

</bundles_post_ra>
